<compile_context>
chip_gen: v5e
topology: v5e:2x2
jax: 0.10.0
libtpu: 0.0.40
codegen_flags: <defaults>
</compile_context>

<pallas_src>
import functools
import numpy as np
import jax
import jax.numpy as jnp
from jax import lax
from jax.experimental import pallas as pl
from jax.experimental.pallas import tpu as pltpu


# ---------------------------------------------------------------------------
# Kernel
#   grid = (B, num_hw_blocks);   reduction axis (H*W blocks) is LAST.
#   x_ref  : (blk, C)   channels-last block of the feature map (any float dtype)
#   w1_ref : (C, mid)   fc1 weight, BN1 scale folded in
#   w2_ref : (mid, C)   fc2 weight, BN2 scale folded in
#   t1_ref : (1, mid)   BN1 shift
#   t2_ref : (1, C)     BN2 shift
#   o_ref  : (1, C)     attention map row for this batch element
#   sum_acc / max_acc : (1, C) f32 running pool accumulators (VMEM scratch)
# ---------------------------------------------------------------------------
def _channel_attention_kernel(x_ref, w1_ref, w2_ref, t1_ref, t2_ref, o_ref,
                              sum_acc, max_acc, *, hw):
    k = pl.program_id(1)
    nk = pl.num_programs(1)

    @pl.when(k == 0)
    def _init():
        sum_acc[...] = jnp.zeros_like(sum_acc)
        max_acc[...] = jnp.full_like(max_acc, -jnp.inf)

    xb = x_ref[...].astype(jnp.float32)              # (blk, C), C on lanes
    blk = xb.shape[0]

    if hw % blk != 0:                                # static: mask padded tail block
        row = lax.broadcasted_iota(jnp.int32, xb.shape, 0) + k * blk
        valid = row < hw
        x_sum = jnp.where(valid, xb, 0.0)
        x_max = jnp.where(valid, xb, -jnp.inf)
    else:
        x_sum = xb
        x_max = xb

    # Single pass: both pools from the same loaded block (sublane reductions).
    sum_acc[...] += jnp.sum(x_sum, axis=0, keepdims=True)                       # (1, C)
    max_acc[...] = jnp.maximum(max_acc[...], jnp.max(x_max, axis=0, keepdims=True))

    @pl.when(k == nk - 1)
    def _finalize():
        avg_p = sum_acc[...] * (1.0 / hw)            # (1, C)
        max_p = max_acc[...]                         # (1, C)
        w1 = w1_ref[...]
        w2 = w2_ref[...]
        t1 = t1_ref[...]
        t2 = t2_ref[...]
        # shared MLP: fc1 (+folded BN1) -> ReLU, per branch; fc2 (+folded BN2) once
        # on the summed hidden (BN2/fc2 are linear, so the branch sum commutes).
        h_a = jnp.maximum(jnp.dot(avg_p, w1, preferred_element_type=jnp.float32) + t1, 0.0)
        h_m = jnp.maximum(jnp.dot(max_p, w1, preferred_element_type=jnp.float32) + t1, 0.0)
        z = jnp.dot(h_a + h_m, w2, preferred_element_type=jnp.float32) + 2.0 * t2
        # hsigmoid = relu6(z + 3) / 6
        o_ref[...] = jnp.minimum(jnp.maximum(z + 3.0, 0.0), 6.0) * (1.0 / 6.0)


# ---------------------------------------------------------------------------
# Glue
# ---------------------------------------------------------------------------
def _pick_hw_block(hw, c, itemsize, target_bytes=2 << 20):
    """Largest multiple-of-8 row block whose bytes stay ~target (or full HW)."""
    if hw <= 8:
        return hw
    rows = min(hw, max(8, target_bytes // max(1, c * itemsize)))
    rows = (rows // 8) * 8
    return hw if rows >= hw else max(8, rows)


def channel_attention_forward(x, params, *, hw_block=None, channels_last=False):
    """x: (B, C, H, W) (module layout) or (B, H, W, C) if channels_last=True."""
    if channels_last:
        B, H, W, C = x.shape
        x_cl = x.reshape(B, H * W, C)
    else:
        B, C, H, W = x.shape
        # Channels-last for the kernel (C on lanes). If the producer can emit
        # NHWC directly, pass channels_last=True and skip this transpose.
        x_cl = jnp.transpose(x.reshape(B, C, H * W), (0, 2, 1))
    hw = H * W
    mid = params["w1f"].shape[1]

    blk = hw_block if hw_block is not None else _pick_hw_block(hw, C, x_cl.dtype.itemsize)
    blk = min(blk, hw)
    if blk < hw:
        blk = max(8, (blk // 8) * 8)
    nk = pl.cdiv(hw, blk)

    kernel = functools.partial(_channel_attention_kernel, hw=hw)

    flops = 2 * B * hw * C + B * (4 * C * mid + 2 * mid * C)
    bytes_accessed = (x_cl.size * x_cl.dtype.itemsize
                      + (2 * C * mid + mid + C) * 4 + B * C * 4)

    out = pl.pallas_call(
        kernel,
        out_shape=jax.ShapeDtypeStruct((B, 1, C), jnp.float32),
        grid=(B, nk),
        in_specs=[
            pl.BlockSpec((None, blk, C), lambda b, k: (b, k, 0)),
            pl.BlockSpec(params["w1f"].shape, lambda b, k: (0, 0)),
            pl.BlockSpec(params["w2f"].shape, lambda b, k: (0, 0)),
            pl.BlockSpec(params["t1"].shape, lambda b, k: (0, 0)),
            pl.BlockSpec(params["t2"].shape, lambda b, k: (0, 0)),
        ],
        out_specs=pl.BlockSpec((None, 1, C), lambda b, k: (b, 0, 0)),
        scratch_shapes=[pltpu.VMEM((1, C), jnp.float32),
                        pltpu.VMEM((1, C), jnp.float32)],
        compiler_params=pltpu.CompilerParams(
            dimension_semantics=("parallel", "arbitrary")),
        cost_estimate=pl.CostEstimate(flops=flops, transcendentals=0,
                                      bytes_accessed=bytes_accessed),
    )(x_cl, params["w1f"], params["w2f"], params["t1"], params["t2"])

    # (B, 1, C) -> (B, C, 1, 1): size-1 dims only, pure relabeling.
    return out.reshape(B, C, 1, 1)


# ---------------------------------------------------------------------------
# Parameters (PyTorch module structure; eval-mode BN running stats)
# ---------------------------------------------------------------------------
def init_params(key, in_planes, ratio=4):
    mid = in_planes // ratio
    ks = jax.random.split(key, 10)
    lim1 = 1.0 / np.sqrt(in_planes)          # Conv2d(in_planes, mid, 1) fan_in
    lim2 = 1.0 / np.sqrt(mid)                # Conv2d(mid, in_planes, 1) fan_in
    w1 = jax.random.uniform(ks[0], (mid, in_planes), jnp.float32, -lim1, lim1)
    w2 = jax.random.uniform(ks[1], (in_planes, mid), jnp.float32, -lim2, lim2)

    g1 = 1.0 + 0.1 * jax.random.normal(ks[2], (mid,), jnp.float32)
    b1 = 0.1 * jax.random.normal(ks[3], (mid,), jnp.float32)
    m1 = 0.05 * jax.random.normal(ks[4], (mid,), jnp.float32)
    v1 = jax.random.uniform(ks[5], (mid,), jnp.float32, 0.5, 1.5)

    g2 = 1.0 + 0.1 * jax.random.normal(ks[6], (in_planes,), jnp.float32)
    b2 = 0.1 * jax.random.normal(ks[7], (in_planes,), jnp.float32)
    m2 = 0.05 * jax.random.normal(ks[8], (in_planes,), jnp.float32)
    v2 = jax.random.uniform(ks[9], (in_planes,), jnp.float32, 0.5, 1.5)

    return dict(w1=w1, w2=w2, bn1=(g1, b1, m1, v1), bn2=(g2, b2, m2, v2))


def prepare_params(raw, eps=1e-5):
    """One-time fold of eval-mode BatchNorm into the 1x1-conv weights."""
    w1, w2 = raw["w1"], raw["w2"]
    g1, b1, m1, v1 = raw["bn1"]
    g2, b2, m2, v2 = raw["bn2"]
    s1 = g1 / jnp.sqrt(v1 + eps)
    t1 = b1 - m1 * s1
    s2 = g2 / jnp.sqrt(v2 + eps)
    t2 = b2 - m2 * s2
    return dict(w1f=(w1 * s1[:, None]).T.astype(jnp.float32),   # (C, mid)
                w2f=(w2 * s2[:, None]).T.astype(jnp.float32),   # (mid, C)
                t1=t1.reshape(1, -1).astype(jnp.float32),       # (1, mid)
                t2=t2.reshape(1, -1).astype(jnp.float32))       # (1, C)


# Pure-JAX reference (un-folded BN formula, NCHW) for correctness checking.
def channel_attention_reference(x, raw, eps=1e-5):
    B, C, H, W = x.shape
    xf = x.astype(jnp.float32).reshape(B, C, H * W)
    w1, w2 = raw["w1"], raw["w2"]
    g1, b1, m1, v1 = raw["bn1"]
    g2, b2, m2, v2 = raw["bn2"]

    def branch(p):                                   # p: (B, C)
        h = jnp.dot(p, w1.T, precision=lax.Precision.HIGHEST)
        h = (h - m1) / jnp.sqrt(v1 + eps) * g1 + b1
        h = jnp.maximum(h, 0.0)
        y = jnp.dot(h, w2.T, precision=lax.Precision.HIGHEST)
        return (y - m2) / jnp.sqrt(v2 + eps) * g2 + b2

    z = branch(jnp.mean(xf, axis=-1)) + branch(jnp.max(xf, axis=-1))
    return (jnp.clip(z + 3.0, 0.0, 6.0) / 6.0).reshape(B, C, 1, 1)


if __name__ == "__main__":
    key = jax.random.PRNGKey(0)
    pkey, xkey1, xkey2 = jax.random.split(key, 3)

    B, C, ratio = 2, 64, 4                            # in_planes=64, mid=16
    raw = init_params(pkey, C, ratio=ratio)
    params = prepare_params(raw)

    # Case 1: 16x16 feature map, bf16 input, single-block (resident) path.
    x1 = jax.random.normal(xkey1, (B, C, 16, 16), jnp.float32).astype(jnp.bfloat16)
    out1 = jax.block_until_ready(jax.jit(channel_attention_forward)(x1, params))
    ref1 = channel_attention_reference(x1, raw)
    assert out1.shape == (B, C, 1, 1)
    assert bool(jnp.all(jnp.isfinite(out1)))
    assert bool(jnp.allclose(out1, ref1, atol=1e-2, rtol=1e-2)), \
        float(jnp.max(jnp.abs(out1 - ref1)))

    # Case 2: 15x15 map, forced small HW block -> exercises the gridded
    # accumulator path and the padded-tail masking.
    x2 = jax.random.normal(xkey2, (B, C, 15, 15), jnp.float32).astype(jnp.bfloat16)
    fwd2 = jax.jit(functools.partial(channel_attention_forward, hw_block=64))
    out2 = jax.block_until_ready(fwd2(x2, params))
    ref2 = channel_attention_reference(x2, raw)
    assert out2.shape == (B, C, 1, 1)
    assert bool(jnp.all(jnp.isfinite(out2)))
    assert bool(jnp.allclose(out2, ref2, atol=1e-2, rtol=1e-2)), \
        float(jnp.max(jnp.abs(out2 - ref2)))

    print("KERNEL_OK")
</pallas_src>

<mosaic_0001>
module attributes {stable_mosaic.version = 11 : i64} {
  func.func @_channel_attention_kernel(%arg0: i32, %arg1: i32, %arg2: memref<1x256x64xbf16, #tpu.memory_space<vmem>>, %arg3: memref<64x16xf32, #tpu.memory_space<vmem>>, %arg4: memref<16x64xf32, #tpu.memory_space<vmem>>, %arg5: memref<1x16xf32, #tpu.memory_space<vmem>>, %arg6: memref<1x64xf32, #tpu.memory_space<vmem>>, %arg7: memref<1x1x64xf32, #tpu.memory_space<vmem>>, %arg8: memref<1x64xf32, #tpu.memory_space<vmem>>, %arg9: memref<1x64xf32, #tpu.memory_space<vmem>>) attributes {dimension_semantics = [#tpu.dimension_semantics<parallel>, #tpu.dimension_semantics<arbitrary>], iteration_bounds = array<i64: 2, 1>, scalar_prefetch = 0 : i64, scratch_operands = 2 : i64, tpu.core_type = #tpu.core_type<tc>, window_params = [{transform_indices = @transform_0, window_bounds = array<i64: 1, 256, 64>}, {pipeline_mode = #tpu.pipeline_mode<synchronous>, transform_indices = @transform_1, window_bounds = array<i64: 64, 16>}, {pipeline_mode = #tpu.pipeline_mode<synchronous>, transform_indices = @transform_2, window_bounds = array<i64: 16, 64>}, {pipeline_mode = #tpu.pipeline_mode<synchronous>, transform_indices = @transform_3, window_bounds = array<i64: 1, 16>}, {pipeline_mode = #tpu.pipeline_mode<synchronous>, transform_indices = @transform_4, window_bounds = array<i64: 1, 64>}, {transform_indices = @transform_5, window_bounds = array<i64: 1, 1, 64>}]} {
    %c0_i32 = arith.constant 0 : i32
    %0 = arith.cmpi eq, %arg1, %c0_i32 : i32
    %1 = arith.extui %0 : i1 to i32
    %c0_i32_0 = arith.constant 0 : i32
    %2 = arith.cmpi ne, %1, %c0_i32_0 : i32
    scf.if %2 {
      %cst_14 = arith.constant 0.000000e+00 : f32
      %19 = vector.broadcast %cst_14 : f32 to vector<1x64xf32>
      %c0_15 = arith.constant 0 : index
      %c0_16 = arith.constant 0 : index
      %20 = vector.load %arg8[%c0_15, %c0_16] : memref<1x64xf32, #tpu.memory_space<vmem>>, vector<1x64xf32>
      tpu.vector_store %arg8[%c0_15, %c0_16], %19 {strides = array<i32>} : memref<1x64xf32, #tpu.memory_space<vmem>>, vector<1x64xf32>,
      %cst_17 = arith.constant 0xFF800000 : f32
      %21 = vector.broadcast %cst_17 : f32 to vector<1x64xf32>
      %c0_18 = arith.constant 0 : index
      %c0_19 = arith.constant 0 : index
      %22 = vector.load %arg9[%c0_18, %c0_19] : memref<1x64xf32, #tpu.memory_space<vmem>>, vector<1x64xf32>
      tpu.vector_store %arg9[%c0_18, %c0_19], %21 {strides = array<i32>} : memref<1x64xf32, #tpu.memory_space<vmem>>, vector<1x64xf32>,
    } else {
    }
    %c0 = arith.constant 0 : index
    %c0_1 = arith.constant 0 : index
    %c0_2 = arith.constant 0 : index
    %3 = vector.load %arg2[%c0, %c0_1, %c0_2] : memref<1x256x64xbf16, #tpu.memory_space<vmem>>, vector<1x256x64xbf16>
    %4 = vector.shape_cast %3 : vector<1x256x64xbf16> to vector<256x64xbf16>
    %5 = arith.extf %4 : vector<256x64xbf16> to vector<256x64xf32>
    %c0_3 = arith.constant 0 : index
    %c0_4 = arith.constant 0 : index
    %6 = vector.load %arg8[%c0_3, %c0_4] : memref<1x64xf32, #tpu.memory_space<vmem>>, vector<1x64xf32>
    %cst = arith.constant dense<0.000000e+00> : vector<64xf32>
    %7 = vector.multi_reduction <add>, %5, %cst [0] : vector<256x64xf32> to vector<64xf32>
    %8 = vector.shape_cast %7 : vector<64xf32> to vector<1x64xf32>
    %9 = arith.addf %6, %8 : vector<1x64xf32>
    %c0_5 = arith.constant 0 : index
    %c0_6 = arith.constant 0 : index
    %10 = vector.load %arg8[%c0_5, %c0_6] : memref<1x64xf32, #tpu.memory_space<vmem>>, vector<1x64xf32>
    tpu.vector_store %arg8[%c0_5, %c0_6], %9 {strides = array<i32>} : memref<1x64xf32, #tpu.memory_space<vmem>>, vector<1x64xf32>,
    %c0_7 = arith.constant 0 : index
    %c0_8 = arith.constant 0 : index
    %11 = vector.load %arg9[%c0_7, %c0_8] : memref<1x64xf32, #tpu.memory_space<vmem>>, vector<1x64xf32>
    %cst_9 = arith.constant dense<0xFF800000> : vector<64xf32>
    %12 = vector.multi_reduction <maximumf>, %5, %cst_9 [0] : vector<256x64xf32> to vector<64xf32>
    %13 = vector.shape_cast %12 : vector<64xf32> to vector<1x64xf32>
    %14 = arith.maximumf %11, %13 : vector<1x64xf32>
    %c0_10 = arith.constant 0 : index
    %c0_11 = arith.constant 0 : index
    %15 = vector.load %arg9[%c0_10, %c0_11] : memref<1x64xf32, #tpu.memory_space<vmem>>, vector<1x64xf32>
    tpu.vector_store %arg9[%c0_10, %c0_11], %14 {strides = array<i32>} : memref<1x64xf32, #tpu.memory_space<vmem>>, vector<1x64xf32>,
    %c0_i32_12 = arith.constant 0 : i32
    %16 = arith.cmpi eq, %arg1, %c0_i32_12 : i32
    %17 = arith.extui %16 : i1 to i32
    %c0_i32_13 = arith.constant 0 : i32
    %18 = arith.cmpi ne, %17, %c0_i32_13 : i32
    scf.if %18 {
      %c0_14 = arith.constant 0 : index
      %c0_15 = arith.constant 0 : index
      %19 = vector.load %arg8[%c0_14, %c0_15] : memref<1x64xf32, #tpu.memory_space<vmem>>, vector<1x64xf32>
      %cst_16 = arith.constant 3.906250e-03 : f32
      %20 = vector.broadcast %cst_16 : f32 to vector<1x64xf32>
      %21 = arith.mulf %19, %20 : vector<1x64xf32>
      %c0_17 = arith.constant 0 : index
      %c0_18 = arith.constant 0 : index
      %22 = vector.load %arg9[%c0_17, %c0_18] : memref<1x64xf32, #tpu.memory_space<vmem>>, vector<1x64xf32>
      %c0_19 = arith.constant 0 : index
      %c0_20 = arith.constant 0 : index
      %23 = vector.load %arg3[%c0_19, %c0_20] : memref<64x16xf32, #tpu.memory_space<vmem>>, vector<64x16xf32>
      %c0_21 = arith.constant 0 : index
      %c0_22 = arith.constant 0 : index
      %24 = vector.load %arg4[%c0_21, %c0_22] : memref<16x64xf32, #tpu.memory_space<vmem>>, vector<16x64xf32>
      %c0_23 = arith.constant 0 : index
      %c0_24 = arith.constant 0 : index
      %25 = vector.load %arg5[%c0_23, %c0_24] : memref<1x16xf32, #tpu.memory_space<vmem>>, vector<1x16xf32>
      %c0_25 = arith.constant 0 : index
      %c0_26 = arith.constant 0 : index
      %26 = vector.load %arg6[%c0_25, %c0_26] : memref<1x64xf32, #tpu.memory_space<vmem>>, vector<1x64xf32>
      %cst_27 = arith.constant dense<0.000000e+00> : vector<1x16xf32>
      %27 = tpu.matmul %21, %23, %cst_27 {dimension_numbers = #tpu.dot_dimension_numbers<[1], [0], [0], [1], [0, 0, 1, 1], [], []>} : vector<1x64xf32>, vector<64x16xf32>, vector<1x16xf32> -> vector<1x16xf32>
      %28 = arith.addf %27, %25 : vector<1x16xf32>
      %cst_28 = arith.constant 0.000000e+00 : f32
      %29 = vector.broadcast %cst_28 : f32 to vector<1x16xf32>
      %30 = arith.maximumf %28, %29 : vector<1x16xf32>
      %cst_29 = arith.constant dense<0.000000e+00> : vector<1x16xf32>
      %31 = tpu.matmul %22, %23, %cst_29 {dimension_numbers = #tpu.dot_dimension_numbers<[1], [0], [0], [1], [0, 0, 1, 1], [], []>} : vector<1x64xf32>, vector<64x16xf32>, vector<1x16xf32> -> vector<1x16xf32>
      %32 = arith.addf %31, %25 : vector<1x16xf32>
      %cst_30 = arith.constant 0.000000e+00 : f32
      %33 = vector.broadcast %cst_30 : f32 to vector<1x16xf32>
      %34 = arith.maximumf %32, %33 : vector<1x16xf32>
      %35 = arith.addf %30, %34 : vector<1x16xf32>
      %cst_31 = arith.constant dense<0.000000e+00> : vector<1x64xf32>
      %36 = tpu.matmul %35, %24, %cst_31 {dimension_numbers = #tpu.dot_dimension_numbers<[1], [0], [0], [1], [0, 0, 1, 1], [], []>} : vector<1x16xf32>, vector<16x64xf32>, vector<1x64xf32> -> vector<1x64xf32>
      %cst_32 = arith.constant 2.000000e+00 : f32
      %37 = vector.broadcast %cst_32 : f32 to vector<1x64xf32>
      %38 = arith.mulf %37, %26 : vector<1x64xf32>
      %39 = arith.addf %36, %38 : vector<1x64xf32>
      %cst_33 = arith.constant 3.000000e+00 : f32
      %40 = vector.broadcast %cst_33 : f32 to vector<1x64xf32>
      %41 = arith.addf %39, %40 : vector<1x64xf32>
      %cst_34 = arith.constant 0.000000e+00 : f32
      %42 = vector.broadcast %cst_34 : f32 to vector<1x64xf32>
      %43 = arith.maximumf %41, %42 : vector<1x64xf32>
      %cst_35 = arith.constant 6.000000e+00 : f32
      %44 = vector.broadcast %cst_35 : f32 to vector<1x64xf32>
      %45 = arith.minimumf %43, %44 : vector<1x64xf32>
      %cst_36 = arith.constant 0.166666672 : f32
      %46 = vector.broadcast %cst_36 : f32 to vector<1x64xf32>
      %47 = arith.mulf %45, %46 : vector<1x64xf32>
      %c0_37 = arith.constant 0 : index
      %c0_38 = arith.constant 0 : index
      %c0_39 = arith.constant 0 : index
      %48 = vector.load %arg7[%c0_37, %c0_38, %c0_39] : memref<1x1x64xf32, #tpu.memory_space<vmem>>, vector<1x1x64xf32>
      %49 = vector.shape_cast %48 : vector<1x1x64xf32> to vector<1x64xf32>
      %50 = vector.shape_cast %47 : vector<1x64xf32> to vector<1x1x64xf32>
      tpu.vector_store %arg7[%c0_37, %c0_38, %c0_39], %50 {strides = array<i32>} : memref<1x1x64xf32, #tpu.memory_space<vmem>>, vector<1x1x64xf32>,
    } else {
    }
    return
  }
  func.func @transform_0(%arg0: i32, %arg1: i32) -> (i32, i32, i32) {
    %c0_i32 = arith.constant 0 : i32
    %c0_i32_0 = arith.constant 0 : i32
    return %arg0, %arg1, %c0_i32 : i32, i32, i32
  }
  func.func @transform_1(%arg0: i32, %arg1: i32) -> (i32, i32) {
    %c0_i32 = arith.constant 0 : i32
    %c0_i32_0 = arith.constant 0 : i32
    %c0_i32_1 = arith.constant 0 : i32
    return %c0_i32, %c0_i32_0 : i32, i32
  }
  func.func @transform_2(%arg0: i32, %arg1: i32) -> (i32, i32) {
    %c0_i32 = arith.constant 0 : i32
    %c0_i32_0 = arith.constant 0 : i32
    %c0_i32_1 = arith.constant 0 : i32
    return %c0_i32, %c0_i32_0 : i32, i32
  }
  func.func @transform_3(%arg0: i32, %arg1: i32) -> (i32, i32) {
    %c0_i32 = arith.constant 0 : i32
    %c0_i32_0 = arith.constant 0 : i32
    %c0_i32_1 = arith.constant 0 : i32
    return %c0_i32, %c0_i32_0 : i32, i32
  }
  func.func @transform_4(%arg0: i32, %arg1: i32) -> (i32, i32) {
    %c0_i32 = arith.constant 0 : i32
    %c0_i32_0 = arith.constant 0 : i32
    %c0_i32_1 = arith.constant 0 : i32
    return %c0_i32, %c0_i32_0 : i32, i32
  }
  func.func @transform_5(%arg0: i32, %arg1: i32) -> (i32, i32, i32) {
    %c0_i32 = arith.constant 0 : i32
    %c0_i32_0 = arith.constant 0 : i32
    %c0_i32_1 = arith.constant 0 : i32
    return %arg0, %c0_i32, %c0_i32_0 : i32, i32, i32
  }
}

</mosaic_0001>

<bundles_post_ra>
// kernel: channel_attention_forward.1
= control target key start
LH: loop header
LB: loop body
LE: loop exit
PB: predicated region body
PF: predicated region fallthrough
CT: control target
= control target key end

     0   :  { %10 = vsyncpa [#allocation5], 0  ;;  %s1375_s0 = inlined_call_operand.hbm [shape: bf16[2,256,64], index: 0, kind: input, shape index: {}]   ;;  %s1376_s1 = inlined_call_operand.vmem [shape: f32[64,16], index: 1, kind: input, shape index: {}]   ;;  %s1377_s2 = inlined_call_operand.vmem [shape: f32[16,64], index: 2, kind: input, shape index: {}]   ;;  %s1378_s3 = inlined_call_operand.vmem [shape: f32[1,16], index: 3, kind: input, shape index: {}]   ;;  %s1379_s4 = inlined_call_operand.vmem [shape: f32[1,64], index: 4, kind: input, shape index: {}]   ;;  %s1380_s5 = inlined_call_operand.hbm [shape: f32[2,1,64], index: 5, kind: output, shape index: {}]  }
   0x1   :  { %12 = vsyncpa [#allocation5 + $0x1], 0 }
   0x2   :  { %13 = vsyncpa [#allocation6], 0 }
   0x3   :  { %15 = vsyncpa [#allocation6 + $0x1], 0  ;;  %s973_s18 = smov 0   ;;  %s975_s19 = smov 0  }
   0x4   :  { %s977_s20 = smov 0   ;;  %s979_s21 = smov 0  }
   0x5   :  { %s981_s22 = smov 0   ;;  %s983_s23 = smov 0  }
   0x6 LB: > { %s665_s24 = sadd.s32 4294967295, %s937_s23   ;;  %s666_s25 = sadd.s32 4294967294, %s937_s23   ;;  %s937_s23 = sphi %s983_s23, %s21_s23   ;;  %s933_s22 = sphi %s981_s22, %s1389_s22   ;;  %s929_s21 = sphi %s979_s21, %s1388_s21   ;;  %s925_s20 = sphi %s977_s20, %s1387_s20   ;;  %s921_s19 = sphi %s975_s19, %s1386_s19   ;;  %s917_s18 = sphi %s973_s18, %s1385_s18  }
   0x7   : > { %s33_s26 = sadd.s32 1, %s933_s22  ;;  %s42_s27 = sadd.s32 1, %s925_s20 }
   0x8   : > { %p35_p0 = scmp.ge.s32.totalorder %s33_s26, 2  ;;  %p49_p1 = scmp.ne.s32.totalorder %s925_s20, %s921_s19 }
   0x9   : > { %p50_p2 = scmp.eq.s32.totalorder %s937_s23, 0  ;;  %p55_p3 = scmp.ne.s32.totalorder %s921_s19, %s917_s18 }
   0xa   : > { %s1391_s26 = smov (%p35_p0, %s33_s26), 0  ;;  %p56_p5 = scmp.eq.s32.totalorder %s665_s24, 0 }
   0xb   : > { %p1014_p4 = por %p50_p2, %p49_p1  ;;  %s37_s29 = ssub.s32 %s933_s22, %s1391_s26 }
   0xc   : > { %p163_p6 = scmp.eq.s32.totalorder %s665_s24, 1  ;;  %p40_p7 = scmp.eq.s32.totalorder %s37_s29, 0 }
   0xd   : > { %p1020_p8 = por %p56_p5, %p55_p3  ;;  %p169_p10 = scmp.eq.s32.totalorder %s666_s25, 1 }
   0xe   : > { %p1024_p9 = por %p163_p6, %p49_p1  ;;  %p668_p12 = scmp.ge.s32.totalorder %s937_s23, 2 }
   0xf   : > { %s1029_s7 = scalar_select %p40_p7, %s925_s20, %s42_s27  }
  0x10   : > { %p1031_p11 = por %p169_p10, %p55_p3  ;;  %p771_p13 = scmp.lt.s32.totalorder %s937_s23, 2 }
  0x11   : > { %s201_s9 = sand.u32 1, %s925_s20   ;;  %s679_s11 = sshll.u32 %s933_s22, 7 }
  0x12   : > { %s669_s10 = sshll.u32 %s201_s9, 7  ;;  %s212_s14 = scalar_lea.hbm %s1375_s0, %s679_s11 }
  0x13   : > { %s205_s15 = scalar_lea.vmem [#allocation4], %s669_s10  ;;  %s213_s17 = sshll.u32 %s212_s14, 4  ;;  %s214_s17 = int_to_ptr.hbm [resolvable:$true] %s213_s17 }
  0x14   : > { %s215_s16 = sshll.u32 %s205_s15, 4  ;;  %p764_p0 = pnand %p771_p13, %p1014_p4  ;;  %s216_s16 = int_to_ptr.vmem [resolvable:$true] %s215_s16 }
  0x15   : > { %p672_p1 = scmp.ge.s32.totalorder %s937_s23, 1  ;;  %s202_s24 = scalar_lea.sflag [#allocation5], %s201_s9 }
  0x16   : > { %s939_s25 = smov 64   ;;  %s940_s27 = smov 4  }
  0x17   : > { %766 = dma.hbm_to_vmem [thread:$0]  (!%p764_p0), %s214_s17, 2048, %s216_s16, %s202_s24, %s939_s25, %s939_s25, %s940_s27  }
  0x18   : > { %p223_p2 = scmp.lt.s32.totalorder %s937_s23, 3 }
  0x1a   : > { %p224_p3 = pnand %p672_p1, %p223_p2 }
  0x1b   : > { %s1047_s29 = sand.u32 (!%p224_p3), 1, %s921_s19  }
  0x1c   : > { %227 = sbr.rel (%p224_p3) target bundleno = 403 (0x193), region = 40  ;;  %s673_s10 = sshll.u32 (!%p224_p3), %s1047_s29, 7 }
  0x1d   : > { %s230_s11 = scalar_lea.sflag (!%p224_p3), [#allocation5], %s1047_s29  ;;  %s1051_s12 = scalar_lea.vmem (!%p224_p3), [#allocation4], %s673_s10 }
  0x21   : > { %908 = dma.done.wait (%p1020_p8), %s230_s11, 2048  }
  0x22   : > { %910 = vsyncadd (%p1020_p8), %s230_s11, 4294965248  ;;  %vm265_vm0 = vcmask 516096   ;;  %v941_v0 = vmov 0.0   ;;  %v491_v1 = vld [vmem:[%s1376_s1 + $0x38] sm:$0xff]  ;;  %v490_v2 = vld [vmem:[%s1376_s1 + $0x30] sm:$0xff]  ;;  %vm333_vm1 = vcmask 523264   ;;  %s584_s11 = scalar_lea.hbm %s1380_s5, %s929_s21 }
  0x23   : > { %266 = vst.msk [vmem:[#allocation2] sm:$0x1] %vm265_vm0, %v941_v0  ;;  %507 = vmatpush.msra.mxu0 %v491_v1  ;;  %531 = vmatpush.msra.mxu1 %v491_v1  ;;  %v489_v3 = vld [vmem:[%s1376_s1 + $0x28] sm:$0xff]  ;;  %v488_v4 = vld [vmem:[%s1376_s1 + $0x20] sm:$0xff]  ;;  %v487_v7 = vld [vmem:[%s1376_s1 + $0x18] sm:$0xff]  ;;  %vm546_vm2 = vcmask 130048  }
  0x24   : > { %v1071_v5 = vld [vmem:[%s1051_s12] sm:$0xff]   ;;  %v1074_v6 = vld [vmem:[%s1051_s12 + $0x8] sm:$0xff]   ;;  %v1086_v12 = vld [vmem:[%s1051_s12 + $0x10] sm:$0xff]   ;;  %s259_s28 = scalar_lea.vmem [#allocation7], %s1047_s29  ;;  %s588_s13 = sshll.u32 %s584_s11, 4  ;;  %s589_s13 = int_to_ptr.hbm [resolvable:$true] %s588_s13 }
  0x25   : > { %508 = vmatpush.msra.mxu0 %v490_v2  ;;  %532 = vmatpush.msra.mxu1 %v490_v2  ;;  %v682_v8 = vunpack.c.l.bf16 %v1071_v5  ;;  %v683_v9 = vunpack.c.h.bf16 %v1071_v5  ;;  %v486_v10 = vld [vmem:[%s1376_s1 + $0x10] sm:$0xff]  ;;  %v686_v11 = vunpack.c.l.bf16 %v1074_v6  ;;  %v687_v13 = vunpack.c.h.bf16 %v1074_v6  ;;  %v485_v14 = vld [vmem:[%s1376_s1 + $0x8] sm:$0xff]  ;;  %v484_v18 = vld [vmem:[%s1376_s1] sm:$0xff]  ;;  %s586_s9 = sshll.u32 %s259_s28, 4  ;;  %s869_s14 = sshra.s32 %s589_s13, 4  ;;  %s587_s9 = int_to_ptr.vmem [resolvable:$true] %s586_s9  ;;  %s870_s14 = int_to_ptr.hbm [resolvable:$true] %s869_s14 }
  0x26   : > { %v690_v15 = vunpack.c.l.bf16 %v1086_v12  ;;  %v1103_v19 = vld [vmem:[%s1051_s12 + $0x18] sm:$0xff]   ;;  %v691_v22 = vunpack.c.h.bf16 %v1086_v12  ;;  %v1110_v23 = vld [vmem:[%s1051_s12 + $0x20] sm:$0xff]   ;;  %v1116_v25 = vld [vmem:[%s1051_s12 + $0x28] sm:$0xff]   ;;  %s871_s15 = scalar_lea.hbm %s870_s14, 1  ;;  %s875_s30 = scalar_lea.hbm %s1380_s5, 2 }
  0x27   : > { %509 = vmatpush.msra.mxu0 %v489_v3  ;;  %533 = vmatpush.msra.mxu1 %v489_v3  ;;  %v334_v16 = vsel %vm333_vm1, %v682_v8, 0.0  ;;  %v335_v17 = vsel %vm333_vm1, %v683_v9, 0.0  ;;  %v337_v21 = vsel %vm333_vm1, %v686_v11, 0.0  ;;  %v339_v24 = vsel %vm333_vm1, %v687_v13, 0.0  ;;  %v1119_v26 = vld [vmem:[%s1051_s12 + $0x30] sm:$0xff]   ;;  %v1123_v29 = vld [vmem:[%s1051_s12 + $0x38] sm:$0xff]   ;;  %p872_p4 = scmp.ne.s32.totalorder %s870_s14, %s871_s15  ;;  %p876_p7 = scmp.lt.s32.totalorder %s870_s14, %s1380_s5 }
  0x28   : > { %v336_v20 = vadd.f32 %v335_v17, %v334_v16  ;;  %v694_v28 = vunpack.c.l.bf16 %v1103_v19  ;;  %v341_v30 = vsel %vm333_vm1, %v690_v15, 0.0  ;;  %v695_v31 = vunpack.c.h.bf16 %v1103_v19  ;;  %v1132_v34 = vld [vmem:[%s1051_s12 + $0x40] sm:$0xff]   ;;  %v1135_v35 = vld [vmem:[%s1051_s12 + $0x48] sm:$0xff]   ;;  %v1141_v40 = vld [vmem:[%s1051_s12 + $0x50] sm:$0xff]   ;;  %p877_p8 = scmp.lt.s32.totalorder %s875_s30, %s871_s15 }
  0x29   : > { %510 = vmatpush.msra.mxu0 %v488_v4  ;;  %534 = vmatpush.msra.mxu1 %v488_v4  ;;  %v698_v32 = vunpack.c.l.bf16 %v1110_v23  ;;  %v699_v33 = vunpack.c.h.bf16 %v1110_v23  ;;  %v702_v37 = vunpack.c.l.bf16 %v1116_v25  ;;  %v703_v38 = vunpack.c.h.bf16 %v1116_v25  ;;  %v1148_v45 = vld [vmem:[%s1051_s12 + $0x58] sm:$0xff]   ;;  %v1151_v46 = vld [vmem:[%s1051_s12 + $0x60] sm:$0xff]   ;;  %v1157_v51 = vld [vmem:[%s1051_s12 + $0x68] sm:$0xff]   ;;  %p873_p5 = pnand %p872_p4, %p1024_p9 }
  0x2a   : > { %v338_v27 = vadd.f32 %v337_v21, %v336_v20  ;;  %v706_v39 = vunpack.c.l.bf16 %v1119_v26  ;;  %v343_v41 = vsel %vm333_vm1, %v691_v22, 0.0  ;;  %v707_v42 = vunpack.c.h.bf16 %v1119_v26  ;;  %v1164_v56 = vld [vmem:[%s1051_s12 + $0x70] sm:$0xff]   ;;  %v1167_v57 = vld [vmem:[%s1051_s12 + $0x78] sm:$0xff]   ;;  %s576_s12 = scalar_lea.sflag [#allocation6], %s1047_s29  ;;  %p878_p10 = por %p877_p8, %p876_p7 }
  0x2b   : > { %511 = vmatpush.msra.mxu0 %v487_v7  ;;  %535 = vmatpush.msra.mxu1 %v487_v7  ;;  %v710_v43 = vunpack.c.l.bf16 %v1123_v29  ;;  %v711_v44 = vunpack.c.h.bf16 %v1123_v29  ;;  %v714_v48 = vunpack.c.l.bf16 %v1132_v34  ;;  %v715_v49 = vunpack.c.h.bf16 %v1132_v34  ;;  %p874_p6 = pneg %p873_p5 }
  0x2c   : > { %v340_v36 = vadd.f32 %v339_v24, %v338_v27  ;;  %v718_v50 = vunpack.c.l.bf16 %v1135_v35  ;;  %v345_v52 = vsel %vm333_vm1, %v694_v28, 0.0  ;;  %v719_v53 = vunpack.c.h.bf16 %v1135_v35 }
  0x2d   : > { %512 = vmatpush.msra.mxu0 %v486_v10  ;;  %536 = vmatpush.msra.mxu1 %v486_v10  ;;  %v722_v54 = vunpack.c.l.bf16 %v1141_v40  ;;  %v723_v55 = vunpack.c.h.bf16 %v1141_v40  ;;  %v726_v59 = vunpack.c.l.bf16 %v1148_v45  ;;  %v727_v60 = vunpack.c.h.bf16 %v1148_v45  ;;  %p879_p13 = pnand %p878_p10, %p874_p6 }
  0x2e   : > { %v342_v47 = vadd.f32 %v341_v30, %v340_v36  ;;  %v730_v61 = vunpack.c.l.bf16 %v1151_v46  ;;  %v347_v62 = vsel %vm333_vm1, %v695_v31, 0.0  ;;  %v731_v63 = vunpack.c.h.bf16 %v1151_v46 }
  0x2f   : > { %513 = vmatpush.msra.mxu0 %v485_v14  ;;  %537 = vmatpush.msra.mxu1 %v485_v14  ;;  %v734_v0 = vunpack.c.l.bf16 %v1157_v51  ;;  %v735_v1 = vunpack.c.h.bf16 %v1157_v51  ;;  %v738_v3 = vunpack.c.l.bf16 %v1164_v56  ;;  %v739_v4 = vunpack.c.h.bf16 %v1164_v56 }
  0x30   : > { %v344_v58 = vadd.f32 %v343_v41, %v342_v47  ;;  %v742_v7 = vunpack.c.l.bf16 %v1167_v57  ;;  %v349_v10 = vsel %vm333_vm1, %v698_v32, 0.0  ;;  %v743_v14 = vunpack.c.h.bf16 %v1167_v57  ;;  %v493_v57 = vld [vmem:[%s1377_s2 + $0x8] sm:$0xff] }
  0x31   : > { %514 = vmatpush.msra.mxu0 %v484_v18  ;;  %538 = vmatpush.msra.mxu1 %v484_v18  ;;  %v351_v17 = vsel %vm333_vm1, %v699_v33, 0.0  ;;  %v353_v18 = vsel %vm333_vm1, %v702_v37, 0.0  ;;  %v407_v19 = vsel %vm333_vm1, %v682_v8, -inf  ;;  %v408_v20 = vsel %vm333_vm1, %v683_v9, -inf }
  0x32   : > { %v346_v2 = vadd.f32 %v345_v52, %v344_v58  ;;  %v409_v21 = vsel %vm333_vm1, %v686_v11, -inf  ;;  %v410_v23 = vsel %vm333_vm1, %v687_v13, -inf  ;;  %v355_v25 = vsel %vm333_vm1, %v703_v38, 0.0  ;;  %564 = vmatpush.msra.mxu2 %v493_v57 }
  0x33   : > { %v411_v26 = vsel %vm333_vm1, %v690_v15, -inf  ;;  %v413_v8 = vsel %vm333_vm1, %v691_v22, -inf  ;;  %v415_v9 = vsel %vm333_vm1, %v694_v28, -inf  ;;  %v417_v30 = vsel %vm333_vm1, %v695_v31, -inf }
  0x34   : > { %v348_v16 = vadd.f32 %v347_v62, %v346_v2  ;;  %v412_v5 = vmax.f32 %v407_v19, %v411_v26  ;;  %v414_v27 = vmax.f32 %v408_v20, %v413_v8  ;;  %v357_v6 = vsel %vm333_vm1, %v706_v39, 0.0 }
  0x35   : > { %v416_v36 = vmax.f32 %v409_v21, %v415_v9  ;;  %v418_v13 = vmax.f32 %v410_v23, %v417_v30  ;;  %v419_v41 = vsel %vm333_vm1, %v698_v32, -inf  ;;  %v421_v47 = vsel %vm333_vm1, %v699_v33, -inf }
  0x36   : > { %v350_v24 = vadd.f32 %v349_v10, %v348_v16  ;;  %v423_v12 = vsel %vm333_vm1, %v702_v37, -inf  ;;  %v425_v15 = vsel %vm333_vm1, %v703_v38, -inf  ;;  %v359_v52 = vsel %vm333_vm1, %v707_v42, 0.0 }
  0x37   : > { %v420_v58 = vmax.f32 %v412_v5, %v419_v41  ;;  %v422_v28 = vmax.f32 %v414_v27, %v421_v47  ;;  %v424_v62 = vmax.f32 %v416_v36, %v423_v12  ;;  %v426_v31 = vmax.f32 %v418_v13, %v425_v15 }
  0x38   : > { %v352_v11 = vadd.f32 %v351_v17, %v350_v24  ;;  %v427_v2 = vsel %vm333_vm1, %v706_v39, -inf  ;;  %v429_v10 = vsel %vm333_vm1, %v707_v42, -inf  ;;  %v361_v32 = vsel %vm333_vm1, %v710_v43, 0.0 }
  0x39   : > { %v428_v33 = vmax.f32 %v420_v58, %v427_v2  ;;  %v430_v37 = vmax.f32 %v422_v28, %v429_v10  ;;  %v431_v38 = vsel %vm333_vm1, %v710_v43, -inf  ;;  %v433_v17 = vsel %vm333_vm1, %v711_v44, -inf }
  0x3a   : > { %v354_v22 = vadd.f32 %v353_v18, %v352_v11  ;;  %v435_v39 = vsel %vm333_vm1, %v714_v48, -inf  ;;  %v437_v42 = vsel %vm333_vm1, %v715_v49, -inf  ;;  %v363_v19 = vsel %vm333_vm1, %v711_v44, 0.0 }
  0x3b   : > { %v432_v20 = vmax.f32 %v424_v62, %v431_v38  ;;  %v434_v21 = vmax.f32 %v426_v31, %v433_v17  ;;  %v436_v43 = vmax.f32 %v428_v33, %v435_v39  ;;  %v438_v23 = vmax.f32 %v430_v37, %v437_v42 }
  0x3c   : > { %v356_v16 = vadd.f32 %v355_v25, %v354_v22  ;;  %v439_v24 = vsel %vm333_vm1, %v718_v50, -inf  ;;  %v441_v25 = vsel %vm333_vm1, %v719_v53, -inf  ;;  %v365_v8 = vsel %vm333_vm1, %v714_v48, 0.0 }
  0x3d   : > { %v440_v29 = vmax.f32 %v432_v20, %v439_v24  ;;  %v442_v5 = vmax.f32 %v434_v21, %v441_v25  ;;  %v443_v44 = vsel %vm333_vm1, %v722_v54, -inf  ;;  %v445_v27 = vsel %vm333_vm1, %v723_v55, -inf }
  0x3e   : > { %v358_v18 = vadd.f32 %v357_v6, %v356_v16  ;;  %v447_v9 = vsel %vm333_vm1, %v726_v59, -inf  ;;  %v449_v30 = vsel %vm333_vm1, %v727_v60, -inf  ;;  %v367_v48 = vsel %vm333_vm1, %v715_v49, 0.0 }
  0x3f   : > { %v444_v6 = vmax.f32 %v436_v43, %v443_v44  ;;  %v446_v36 = vmax.f32 %v438_v23, %v445_v27  ;;  %v448_v13 = vmax.f32 %v440_v29, %v447_v9  ;;  %v450_v41 = vmax.f32 %v442_v5, %v449_v30 }
  0x40   : > { %v360_v26 = vadd.f32 %v359_v52, %v358_v18  ;;  %v451_v47 = vsel %vm333_vm1, %v730_v61, -inf  ;;  %v453_v12 = vsel %vm333_vm1, %v731_v63, -inf  ;;  %v455_v34 = vsel %vm333_vm1, %v734_v0, -inf }
  0x41   : > { %v452_v22 = vmax.f32 %v444_v6, %v451_v47  ;;  %v454_v52 = vmax.f32 %v446_v36, %v453_v12  ;;  %v456_v49 = vmax.f32 %v448_v13, %v455_v34  ;;  %v457_v58 = vsel %vm333_vm1, %v735_v1, -inf }
  0x42   : > { %v362_v11 = vadd.f32 %v361_v32, %v360_v26  ;;  %v459_v28 = vsel %vm333_vm1, %v738_v3, -inf  ;;  %v461_v62 = vsel %vm333_vm1, %v739_v4, -inf  ;;  %v458_v2 = vmax.f32 %v450_v41, %v457_v58 }
  0x43   : > { %v460_v10 = vmax.f32 %v452_v22, %v459_v28  ;;  %v462_v16 = vmax.f32 %v454_v52, %v461_v62  ;;  %v369_v32 = vsel %vm333_vm1, %v718_v50, 0.0  ;;  %v463_v33 = vsel %vm333_vm1, %v742_v7, -inf  ;;  %v332_v52 = vld [vmem:[#allocation2] sm:$0x1] }
  0x44   : > { %v364_v15 = vadd.f32 %v363_v19, %v362_v11  ;;  %v465_v37 = vsel %vm333_vm1, %v743_v14, -inf  ;;  %v464_v17 = vmax.f32 %v456_v49, %v463_v33  ;;  %v371_v18 = vsel %vm333_vm1, %v719_v53, 0.0  ;;  %v494_v28 = vld [vmem:[%s1378_s3] sm:$0x1] }
  0x45   : > { %v466_v39 = vmax.f32 %v458_v2, %v465_v37  ;;  %v467_v42 = vmax.f32 %v460_v10, %v462_v16  ;;  %v373_v50 = vsel %vm333_vm1, %v722_v54, 0.0  ;;  %v942_v43 = vmov -inf   ;;  %v495_v37 = vld [vmem:[%s1379_s4] sm:$0x1] }
  0x46   : > { %v366_v31 = vadd.f32 %v365_v8, %v364_v15  ;;  %267 = vst.msk [vmem:[#allocation3] sm:$0x1] %vm265_vm0, %v942_v43  ;;  %v375_v24 = vsel %vm333_vm1, %v723_v55, 0.0  ;;  %v377_v35 = vsel %vm333_vm1, %v726_v59, 0.0  ;;  %v379_v54 = vsel %vm333_vm1, %v727_v60, 0.0 }
  0x47   : > { %v468_v20 = vmax.f32 %v464_v17, %v466_v39  ;;  %v381_v40 = vsel %vm333_vm1, %v730_v61, 0.0  ;;  %v383_v27 = vsel %vm333_vm1, %v731_v63, 0.0  ;;  %v385_v45 = vsel %vm333_vm1, %v734_v0, 0.0 }
  0x48   : > { %v368_v38 = vadd.f32 %v367_v48, %v366_v31  ;;  %v387_v48 = vsel %vm333_vm1, %v735_v1, 0.0  ;;  %v389_v46 = vsel %vm333_vm1, %v738_v3, 0.0  ;;  %v391_v0 = vsel %vm333_vm1, %v739_v4, 0.0 }
  0x49   : > { %v469_v23 = vmax.f32 %v467_v42, %v468_v20  ;;  %v393_v51 = vsel %vm333_vm1, %v742_v7, 0.0  ;;  %v395_v1 = vsel %vm333_vm1, %v743_v14, 0.0  ;;  %v492_v14 = vld [vmem:[%s1377_s2] sm:$0xff] }
  0x4a   : > { %v370_v19 = vadd.f32 %v369_v32, %v368_v38  ;;  %565 = vmatpush.msra.mxu2 %v492_v14  ;;  %v545_v38 = vmul.f32 2.0, %v495_v37 }
  0x4b   : > { %v470_v26 = vrot.slane %v469_v23, 4 }
  0x4c   : > { %v372_v21 = vadd.f32 %v371_v18, %v370_v19 }
  0x4d   : > { %v471_v8 = vmax.f32 %v469_v23, %v470_v26  ;;  %v406_v30 = vld [vmem:[#allocation3] sm:$0x1] }
  0x4e   : > { %v374_v25 = vadd.f32 %v373_v50, %v372_v21 }
  0x4f   : > { %v472_v5 = vrot.slane %v471_v8, 2 }
  0x50   : > { %v376_v53 = vadd.f32 %v375_v24, %v374_v25 }
  0x51   : > { %v473_v55 = vmax.f32 %v471_v8, %v472_v5 }
  0x52   : > { %v378_v29 = vadd.f32 %v377_v35, %v376_v53 }
  0x53   : > { %v474_v59 = vrot.slane %v473_v55, 1 }
  0x54   : > { %v380_v44 = vadd.f32 %v379_v54, %v378_v29 }
  0x55   : > { %v475_v11 = vmax.f32 %v473_v55, %v474_v59 }
  0x56   : > { %v382_v9 = vadd.f32 %v381_v40, %v380_v44 }
  0x57   : > { %v476_v6 = vmax.f32 %v406_v30, %v475_v11 }
  0x58   : > { %v384_v60 = vadd.f32 %v383_v27, %v382_v9 }
  0x59   : > { %477 = vst.msk [vmem:[#allocation3] sm:$0x1] %vm265_vm0, %v476_v6 }
  0x5a   : > { %v386_v61 = vadd.f32 %v385_v45, %v384_v60 }
  0x5c   : > { %v388_v63 = vadd.f32 %v387_v48, %v386_v61 }
  0x5e   : > { %v390_v36 = vadd.f32 %v389_v46, %v388_v63 }
  0x60   : > { %v392_v13 = vadd.f32 %v391_v0, %v390_v36  ;;  %v483_v47 = vld [vmem:[#allocation3] sm:$0x1] }
  0x61   : > { %675 = vmatmul.msk.f32.vlgmr.msra.gmra.mxu1 %vm333_vm1, %v483_v47 }
  0x62   : > { %v394_v41 = vadd.f32 %v393_v51, %v392_v13 }
  0x64   : > { %v396_v3 = vadd.f32 %v395_v1, %v394_v41 }
  0x66   : > { %v397_v12 = vrot.slane %v396_v3, 4 }
  0x68   : > { %v398_v15 = vadd.f32 %v397_v12, %v396_v3 }
  0x6a   : > { %v399_v56 = vrot.slane %v398_v15, 2 }
  0x6c   : > { %v400_v22 = vadd.f32 %v399_v56, %v398_v15 }
  0x6e   : > { %v401_v4 = vrot.slane %v400_v22, 1 }
  0x70   : > { %v402_v34 = vadd.f32 %v401_v4, %v400_v22 }
  0x72   : > { %v403_v49 = vadd.f32 %v402_v34, %v332_v52 }
  0x74   : > { %405 = vst.msk [vmem:[#allocation2] sm:$0x1] %vm265_vm0, %v403_v49 }
  0x7b   : > { %v481_v7 = vld [vmem:[#allocation2] sm:$0x1] }
  0x7c   : > { %v482_v58 = vmul.f32 0.00390625, %v481_v7 }
  0x7e   : > { %674 = vmatmul.msk.f32.vlgmr.msra.gmra.mxu0 %vm333_vm1, %v482_v58 }
  0xde   : > { %v540_v62 = vpop.f32.mrf.mxu1 }
  0xdf   : > { %v541_v31 = vadd.f32 %v540_v62, %v494_v28 }
  0xe1   : > { %v543_v16 = vmax.f32 %v541_v31, 0.0 }
  0xfb   : > { %v516_v2 = vpop.f32.mrf.mxu0 }
  0xfc   : > { %v517_v10 = vadd.f32 %v516_v2, %v494_v28 }
  0xfe   : > { %v519_v32 = vmax.f32 %v517_v10, 0.0 }
 0x100   : > { %v544_v33 = vadd.f32 %v543_v16, %v519_v32 }
 0x102   : > { %676 = vmatmul.msk.f32.vlgmr.msra.gmra.mxu2 %vm546_vm2, %v544_v33 }
 0x185   : > { %v567_v17 = vpop.f32.mrf.mxu2 }
 0x186   : > { %v568_v39 = vadd.f32 %v567_v17, %v545_v38 }
 0x188   : > { %v570_v42 = vadd.f32 3.0, %v568_v39 }
 0x18a   : > { %v571_v18 = vmax.f32 %v570_v42, 0.0 }
 0x18c   : > { %v572_v19 = vmin.f32 %v571_v18, 6.0 }
 0x18e   : > { %v573_v20 = vmul.f32 0.16666667, %v572_v19 }
 0x190   : > { %574 = vst.msk [vmem:[%s259_s28] sm:$0x1] %vm265_vm0, %v573_v20 }
 0x191   : > { %882 = shalt.err (!%p879_p13)
}
 0x192   : > { %761 = dma.vmem_to_hbm [thread:$0]  (%p1024_p9), %s587_s9, 16, %s589_s13, %s576_s12  }
 0x193 PF: > { %s600_s29 = sand.u32 1, %s917_s18   ;;  %p768_p0 = pnand %p668_p12, %p1031_p11 }
 0x194   : > { %s601_s25 = scalar_lea.sflag [#allocation6], %s600_s29 }
 0x195   : > { %p769_p1 = pneg %p768_p0 }
 0x197   : > { %912 = dma.done.wait (%p769_p1), %s601_s25, 16  }
 0x198   : > { %914 = vsyncadd (%p769_p1), %s601_s25, 4294967280  ;;  %s21_s23 = sadd.s32 1, %s937_s23   ;;  %s1385_s18 = smov %s921_s19 }
 0x199   : > { %p18_p2 = scmp.ge.s32.totalorder %s21_s23, 4   ;;  %s1386_s19 = smov %s925_s20 }
 0x19a   : > { %s1387_s20 = smov %s1029_s7  ;;  %s1388_s21 = smov %s933_s22 }
 0x19b   : > { %s1389_s22 = smov %s1391_s26  ;;  %20 = sbr.rel (!%p18_p2) target bundleno = 6 (0x6), region = 93 }
 0x1a0   :  { %606 = vsyncpa [#allocation5], 1 }
 0x1a1   :  { %608 = vsyncpa [#allocation5 + $0x1], 1 }
 0x1a2   :  { %609 = vsyncpa [#allocation6], 1 }
 0x1a3   :  { %611 = vsyncpa [#allocation6 + $0x1], 1 }

</bundles_post_ra>
